<compile_context>
chip_gen: v7x
topology: tpu7x:2x2x1
jax: 0.10.0
libtpu: 0.0.40
codegen_flags: <defaults>
</compile_context>

<pallas_src>
import jax
import jax.numpy as jnp
from jax.experimental import pallas as pl
from jax.experimental.pallas import tpu as pltpu


def _make_flow_kernel(BH, H, W):
    """Kernel over a (BH, W) = (Bc*H, W) block of stacked image planes."""

    def kernel(inp_ref, lab_ref, out_ref):
        # Sobel is linear: grad(input) - grad(label) == grad(input - label).
        d = inp_ref[...].astype(jnp.float32) - lab_ref[...].astype(jnp.float32)

        # Row-within-plane / column indices for the zero-padding masks.
        rowp = jax.lax.broadcasted_iota(jnp.int32, (BH, W), 0) % H
        col = jax.lax.broadcasted_iota(jnp.int32, (BH, W), 1)
        first_row = rowp == 0
        last_row = rowp == (H - 1)
        first_col = col == 0
        last_col = col == (W - 1)

        # Shifted copies of d with zero-padding semantics.  pltpu.roll follows
        # np.roll: roll(d, 1, axis=0)[i, j] == d[i-1, j].  The wrapped (or
        # neighbouring-plane) rows/cols are exactly the ones masked to zero.
        up = jnp.where(first_row, 0.0, pltpu.roll(d, 1, axis=0))        # d[i-1, j]
        down = jnp.where(last_row, 0.0, pltpu.roll(d, BH - 1, axis=0))  # d[i+1, j]
        left = jnp.where(first_col, 0.0, pltpu.roll(d, 1, axis=1))      # d[i, j-1]
        right = jnp.where(last_col, 0.0, pltpu.roll(d, W - 1, axis=1))  # d[i, j+1]

        # Separable Sobel (cross-correlation orientation, like nn.Conv2d):
        #   Gx[i,j] = s[i, j+1] - s[i, j-1],  s[i,j] = d[i-1,j] + 2 d[i,j] + d[i+1,j]
        #   Gy[i,j] = t[i-1, j] - t[i+1, j],  t[i,j] = d[i,j-1] + 2 d[i,j] + d[i,j+1]
        s = up + 2.0 * d + down
        t = left + 2.0 * d + right

        s_r = jnp.where(last_col, 0.0, pltpu.roll(s, W - 1, axis=1))    # s[i, j+1]
        s_l = jnp.where(first_col, 0.0, pltpu.roll(s, 1, axis=1))       # s[i, j-1]
        t_u = jnp.where(first_row, 0.0, pltpu.roll(t, 1, axis=0))       # t[i-1, j]
        t_d = jnp.where(last_row, 0.0, pltpu.roll(t, BH - 1, axis=0))   # t[i+1, j]

        gx = s_r - s_l
        gy = t_u - t_d
        block_sum = jnp.sum(jnp.abs(gx) + jnp.abs(gy))

        # Lane-dense per-block partial sum (replicated across the (8,128) tile).
        out_ref[...] = jnp.full(out_ref.shape, block_sum, dtype=out_ref.dtype)

    return kernel


def _vmem_limit_bytes():
    """Generation-aware scoped-VMEM request (~3/4 of per-core capacity)."""
    cap = 64 * 1024 * 1024  # safe fallback == v7x per-TensorCore capacity
    try:
        info = pltpu.get_tpu_info()
        cap = int(getattr(info, "vmem_capacity_bytes", cap) or cap)
    except Exception:
        pass
    return min((cap * 3) // 4, 96 * 1024 * 1024)


def _pick_bc(B, H, footprint, budget):
    """Largest plane-group Bc that fits, preferring G = B/Bc even (ideally >= 4)."""
    aligned = [c for c in range(1, B + 1)
               if B % c == 0 and ((c * H) % 8 == 0 or c == B)]
    fitting = [c for c in aligned if footprint(c) <= budget]
    if not fitting:
        # TODO(synk): tile H with a 2-row halo when even the smallest legal
        # row group exceeds the VMEM budget (overlapping blocks need
        # pl.Element row offsets or a manual-DMA pipeline).
        return min(aligned)
    for good_g in (lambda g: g % 2 == 0 and g >= 4,   # both v7x cores + pipelining
                   lambda g: g % 2 == 0 and g >= 2,   # both v7x cores
                   lambda g: g >= 2):                 # at least some overlap
        tier = [c for c in fitting if good_g(B // c)]
        if tier:
            return max(tier)
    return max(fitting)


def flow_loss(input_nchw, label_nchw, refL=None, refR=None):
    """Pallas implementation of FlowLoss.forward. refL/refR are unused (as in torch)."""
    N, C, H, W = input_nchw.shape
    B = N * C
    # Depthwise conv: every (n, c) plane is independent; flatten plane rows so
    # all shifts in the kernel are plain 2-D lane/sublane rolls.
    x = input_nchw.reshape(B * H, W)   # keep source dtype; upcast happens in-kernel
    y = label_nchw.reshape(B * H, W)

    itemsize = jnp.dtype(x.dtype).itemsize
    vmem_limit = _vmem_limit_bytes()
    budget = (vmem_limit * 7) // 10  # headroom for Mosaic-internal scratch

    # Per-element VMEM cost of one grid step: 2 inputs x double buffer, plus a
    # conservative count of compiler-managed block-sized f32 temporaries
    # (d, shifted copies, s, t, gx, gy, iota/masks, ...).
    TEMP_F32 = 12

    def footprint(c):
        elems = c * H * W
        return elems * (2 * 2 * itemsize + TEMP_F32 * 4)

    Bc = _pick_bc(B, H, footprint, budget)
    G = B // Bc
    BH = Bc * H

    partials = pl.pallas_call(
        _make_flow_kernel(BH, H, W),
        out_shape=jax.ShapeDtypeStruct((G, 8, 128), jnp.float32),
        grid_spec=pltpu.PrefetchScalarGridSpec(
            num_scalar_prefetch=0,
            grid=(G,),
            in_specs=[
                pl.BlockSpec((BH, W), lambda b: (b, 0)),
                pl.BlockSpec((BH, W), lambda b: (b, 0)),
            ],
            out_specs=pl.BlockSpec((1, 8, 128), lambda b: (b, 0, 0)),
        ),
        compiler_params=pltpu.CompilerParams(
            dimension_semantics=("parallel",),   # independent blocks -> both v7x TCs
            vmem_limit_bytes=vmem_limit,
        ),
    )(x, y)

    total = jnp.sum(partials[:, 0, 0])
    numel = 2 * N * C * H * W  # diff = cat([diffGx, diffGy], dim=1)
    return total / numel


def _flow_loss_ref(input_nchw, label_nchw):
    """Pure-JAX reference (lax.conv) for a correctness check."""
    gx = jnp.array([[-1, 0, 1], [-2, 0, 2], [-1, 0, 1]], dtype=jnp.float32)
    gy = jnp.array([[1, 2, 1], [0, 0, 0], [-1, -2, -1]], dtype=jnp.float32)
    N, C, H, W = input_nchw.shape
    wx = jnp.broadcast_to(gx[None, None], (C, 1, 3, 3))
    wy = jnp.broadcast_to(gy[None, None], (C, 1, 3, 3))

    def dconv(x, w):
        return jax.lax.conv_general_dilated(
            x.astype(jnp.float32), w, window_strides=(1, 1), padding="SAME",
            dimension_numbers=("NCHW", "OIHW", "NCHW"), feature_group_count=C)

    diff_gx = jnp.abs(dconv(input_nchw, wx) - dconv(label_nchw, wx))
    diff_gy = jnp.abs(dconv(input_nchw, wy) - dconv(label_nchw, wy))
    diff = jnp.concatenate([diff_gx, diff_gy], axis=1)
    return jnp.sum(diff) / diff.size


if __name__ == "__main__":
    key = jax.random.PRNGKey(0)
    k1, k2, k3, k4 = jax.random.split(key, 4)
    N, C, H, W = 2, 3, 16, 16  # FlowLoss requires 3 channels (groups=3 conv)
    x = jax.random.normal(k1, (N, C, H, W), dtype=jnp.float32)
    lab = jax.random.normal(k2, (N, C, H, W), dtype=jnp.float32)
    refL = jax.random.normal(k3, (N, C, H, W), dtype=jnp.float32)  # unused, like torch
    refR = jax.random.normal(k4, (N, C, H, W), dtype=jnp.float32)  # unused, like torch

    loss = jax.block_until_ready(flow_loss(x, lab, refL, refR))
    ref = jax.block_until_ready(_flow_loss_ref(x, lab))
    assert jnp.allclose(loss, ref, rtol=1e-4, atol=1e-5), (loss, ref)

    print("KERNEL_OK")
</pallas_src>

<mosaic_0001>
module attributes {stable_mosaic.version = 11 : i64} {
  func.func @kernel(%arg0: i32, %arg1: memref<16x16xf32, #tpu.memory_space<vmem>>, %arg2: memref<16x16xf32, #tpu.memory_space<vmem>>, %arg3: memref<1x8x128xf32, #tpu.memory_space<vmem>>) attributes {dimension_semantics = [#tpu.dimension_semantics<parallel>], iteration_bounds = array<i64: 6>, scalar_prefetch = 0 : i64, scratch_operands = 0 : i64, tpu.core_type = #tpu.core_type<tc>, window_params = [{transform_indices = @transform_0, window_bounds = array<i64: 16, 16>}, {transform_indices = @transform_1, window_bounds = array<i64: 16, 16>}, {transform_indices = @transform_2, window_bounds = array<i64: 1, 8, 128>}]} {
    %c0 = arith.constant 0 : index
    %c0_0 = arith.constant 0 : index
    %0 = vector.load %arg1[%c0, %c0_0] : memref<16x16xf32, #tpu.memory_space<vmem>>, vector<16x16xf32>
    %c0_1 = arith.constant 0 : index
    %c0_2 = arith.constant 0 : index
    %1 = vector.load %arg2[%c0_1, %c0_2] : memref<16x16xf32, #tpu.memory_space<vmem>>, vector<16x16xf32>
    %2 = arith.subf %0, %1 : vector<16x16xf32>
    %3 = tpu.iota {dimensions = array<i32: 0>} : vector<16x16xi32>
    %c16_i32 = arith.constant 16 : i32
    %c0_i32 = arith.constant 0 : i32
    %4 = arith.cmpi eq, %c16_i32, %c0_i32 : i32
    %c1_i32 = arith.constant 1 : i32
    %5 = arith.select %4, %c1_i32, %c16_i32 : i32
    %6 = vector.broadcast %5 : i32 to vector<16x16xi32>
    %7 = arith.remsi %3, %6 : vector<16x16xi32>
    %c0_i32_3 = arith.constant 0 : i32
    %8 = vector.broadcast %c0_i32_3 : i32 to vector<16x16xi32>
    %9 = arith.cmpi ne, %7, %8 : vector<16x16xi32>
    %c0_i32_4 = arith.constant 0 : i32
    %10 = vector.broadcast %c0_i32_4 : i32 to vector<16x16xi32>
    %11 = arith.cmpi slt, %7, %10 : vector<16x16xi32>
    %c0_i32_5 = arith.constant 0 : i32
    %12 = arith.cmpi slt, %5, %c0_i32_5 : i32
    %13 = vector.broadcast %12 : i1 to vector<16x16xi1>
    %14 = vector.broadcast %13 : vector<16x16xi1> to vector<16x16xi1>
    %15 = arith.xori %11, %14 : vector<16x16xi1>
    %16 = arith.andi %15, %9 : vector<16x16xi1>
    %17 = vector.broadcast %5 : i32 to vector<16x16xi32>
    %18 = arith.addi %7, %17 : vector<16x16xi32>
    %19 = arith.select %16, %18, %7 : vector<16x16xi1>, vector<16x16xi32>
    %20 = tpu.iota {dimensions = array<i32: 1>} : vector<16x16xi32>
    %c0_i32_6 = arith.constant 0 : i32
    %21 = vector.broadcast %c0_i32_6 : i32 to vector<16x16xi32>
    %22 = arith.cmpi eq, %19, %21 : vector<16x16xi32>
    %c15_i32 = arith.constant 15 : i32
    %23 = vector.broadcast %c15_i32 : i32 to vector<16x16xi32>
    %24 = arith.cmpi eq, %19, %23 : vector<16x16xi32>
    %c0_i32_7 = arith.constant 0 : i32
    %25 = vector.broadcast %c0_i32_7 : i32 to vector<16x16xi32>
    %26 = arith.cmpi eq, %20, %25 : vector<16x16xi32>
    %c15_i32_8 = arith.constant 15 : i32
    %27 = vector.broadcast %c15_i32_8 : i32 to vector<16x16xi32>
    %28 = arith.cmpi eq, %20, %27 : vector<16x16xi32>
    %c1_i32_9 = arith.constant 1 : i32
    %29 = tpu.dynamic_rotate %2 by %c1_i32_9 dim 0 : vector<16x16xf32>, i32 -> vector<16x16xf32>
    %cst = arith.constant 0.000000e+00 : f32
    %30 = vector.broadcast %cst : f32 to vector<16x16xf32>
    %31 = arith.select %22, %30, %29 : vector<16x16xi1>, vector<16x16xf32>
    %c15_i32_10 = arith.constant 15 : i32
    %32 = tpu.dynamic_rotate %2 by %c15_i32_10 dim 0 : vector<16x16xf32>, i32 -> vector<16x16xf32>
    %cst_11 = arith.constant 0.000000e+00 : f32
    %33 = vector.broadcast %cst_11 : f32 to vector<16x16xf32>
    %34 = arith.select %24, %33, %32 : vector<16x16xi1>, vector<16x16xf32>
    %c1_i32_12 = arith.constant 1 : i32
    %35 = tpu.dynamic_rotate %2 by %c1_i32_12 dim 1 : vector<16x16xf32>, i32 -> vector<16x16xf32>
    %cst_13 = arith.constant 0.000000e+00 : f32
    %36 = vector.broadcast %cst_13 : f32 to vector<16x16xf32>
    %37 = arith.select %26, %36, %35 : vector<16x16xi1>, vector<16x16xf32>
    %c15_i32_14 = arith.constant 15 : i32
    %38 = tpu.dynamic_rotate %2 by %c15_i32_14 dim 1 : vector<16x16xf32>, i32 -> vector<16x16xf32>
    %cst_15 = arith.constant 0.000000e+00 : f32
    %39 = vector.broadcast %cst_15 : f32 to vector<16x16xf32>
    %40 = arith.select %28, %39, %38 : vector<16x16xi1>, vector<16x16xf32>
    %cst_16 = arith.constant 2.000000e+00 : f32
    %41 = vector.broadcast %cst_16 : f32 to vector<16x16xf32>
    %42 = arith.mulf %41, %2 : vector<16x16xf32>
    %43 = arith.addf %31, %42 : vector<16x16xf32>
    %44 = arith.addf %43, %34 : vector<16x16xf32>
    %cst_17 = arith.constant 2.000000e+00 : f32
    %45 = vector.broadcast %cst_17 : f32 to vector<16x16xf32>
    %46 = arith.mulf %45, %2 : vector<16x16xf32>
    %47 = arith.addf %37, %46 : vector<16x16xf32>
    %48 = arith.addf %47, %40 : vector<16x16xf32>
    %c15_i32_18 = arith.constant 15 : i32
    %49 = tpu.dynamic_rotate %44 by %c15_i32_18 dim 1 : vector<16x16xf32>, i32 -> vector<16x16xf32>
    %cst_19 = arith.constant 0.000000e+00 : f32
    %50 = vector.broadcast %cst_19 : f32 to vector<16x16xf32>
    %51 = arith.select %28, %50, %49 : vector<16x16xi1>, vector<16x16xf32>
    %c1_i32_20 = arith.constant 1 : i32
    %52 = tpu.dynamic_rotate %44 by %c1_i32_20 dim 1 : vector<16x16xf32>, i32 -> vector<16x16xf32>
    %cst_21 = arith.constant 0.000000e+00 : f32
    %53 = vector.broadcast %cst_21 : f32 to vector<16x16xf32>
    %54 = arith.select %26, %53, %52 : vector<16x16xi1>, vector<16x16xf32>
    %c1_i32_22 = arith.constant 1 : i32
    %55 = tpu.dynamic_rotate %48 by %c1_i32_22 dim 0 : vector<16x16xf32>, i32 -> vector<16x16xf32>
    %cst_23 = arith.constant 0.000000e+00 : f32
    %56 = vector.broadcast %cst_23 : f32 to vector<16x16xf32>
    %57 = arith.select %22, %56, %55 : vector<16x16xi1>, vector<16x16xf32>
    %c15_i32_24 = arith.constant 15 : i32
    %58 = tpu.dynamic_rotate %48 by %c15_i32_24 dim 0 : vector<16x16xf32>, i32 -> vector<16x16xf32>
    %cst_25 = arith.constant 0.000000e+00 : f32
    %59 = vector.broadcast %cst_25 : f32 to vector<16x16xf32>
    %60 = arith.select %24, %59, %58 : vector<16x16xi1>, vector<16x16xf32>
    %61 = arith.subf %51, %54 : vector<16x16xf32>
    %62 = arith.subf %57, %60 : vector<16x16xf32>
    %63 = math.absf %61 : vector<16x16xf32>
    %64 = math.absf %62 : vector<16x16xf32>
    %65 = arith.addf %63, %64 : vector<16x16xf32>
    %66 = vector.shape_cast %65 : vector<16x16xf32> to vector<1x16x16xf32>
    %cst_26 = arith.constant dense<0.000000e+00> : vector<1xf32>
    %67 = vector.multi_reduction <add>, %66, %cst_26 [1, 2] : vector<1x16x16xf32> to vector<1xf32>
    %68 = vector.shape_cast %67 : vector<1xf32> to vector<1x1x1xf32>
    %69 = vector.extract %68[0, 0, 0] : f32 from vector<1x1x1xf32>
    %70 = vector.broadcast %69 : f32 to vector<1x8x128xf32>
    %c0_27 = arith.constant 0 : index
    %c0_28 = arith.constant 0 : index
    %c0_29 = arith.constant 0 : index
    %71 = vector.load %arg3[%c0_27, %c0_28, %c0_29] : memref<1x8x128xf32, #tpu.memory_space<vmem>>, vector<1x8x128xf32>
    tpu.vector_store %arg3[%c0_27, %c0_28, %c0_29], %70 {strides = array<i32>} : memref<1x8x128xf32, #tpu.memory_space<vmem>>, vector<1x8x128xf32>,
    return
  }
  func.func @transform_0(%arg0: i32) -> (i32, i32) {
    %c0_i32 = arith.constant 0 : i32
    %c0_i32_0 = arith.constant 0 : i32
    return %arg0, %c0_i32 : i32, i32
  }
  func.func @transform_1(%arg0: i32) -> (i32, i32) {
    %c0_i32 = arith.constant 0 : i32
    %c0_i32_0 = arith.constant 0 : i32
    return %arg0, %c0_i32 : i32, i32
  }
  func.func @transform_2(%arg0: i32) -> (i32, i32, i32) {
    %c0_i32 = arith.constant 0 : i32
    %c0_i32_0 = arith.constant 0 : i32
    %c0_i32_1 = arith.constant 0 : i32
    return %arg0, %c0_i32, %c0_i32_0 : i32, i32, i32
  }
}

</mosaic_0001>

<bundles_post_ra>
// kernel: tpu_custom_call.1
= control target key start
LH: loop header
LB: loop body
LE: loop exit
PB: predicated region body
PF: predicated region fallthrough
CT: control target
= control target key end

     0   :  { %7 = vsyncpa [#allocation3], 0  ;;  %s720_s0 = inlined_call_operand.vmem [shape: f32[96,16], index: 0, kind: input, shape index: {}]   ;;  %s721_s1 = inlined_call_operand.vmem [shape: f32[96,16], index: 1, kind: input, shape index: {}]   ;;  %s722_s2 = inlined_call_operand.hbm [shape: f32[6,8,128], index: 2, kind: output, shape index: {}]  }
   0x1   :  { %9 = vsyncpa [#allocation3 + $0x1], 0  ;;  %s554_s9 = smov 0   ;;  %s556_s10 = smov 0  }
   0x2   :  { %s558_s11 = smov 0   ;;  %s560_s12 = smov 0  }
   0x3 LB: > { %s575_s13 = sadd.s32 4294967295, %s533_s12   ;;  %s414_s14 = sadd.s32 4294967294, %s533_s12   ;;  %s533_s12 = sphi %s560_s12, %s732_s12   ;;  %s529_s11 = sphi %s558_s11, %s731_s11   ;;  %s525_s10 = sphi %s556_s10, %s730_s10   ;;  %s521_s9 = sphi %s554_s9, %s729_s9  }
   0x4   : > { %s579_s15 = sadd.s32 1, %s533_s12   ;;  %s74_s16 = sadd.s32 1, %s529_s11 }
   0x5   : > { %s71_s17 = ssub.s32 %s533_s12, %s579_s15  ;;  %p84_p0 = scmp.ne.s32.totalorder %s529_s11, %s525_s10 }
   0x6   : > { %p72_p1 = scmp.eq.s32.totalorder %s71_s17, 0  ;;  %p85_p2 = scmp.eq.s32.totalorder %s575_s13, 5 }
   0x7   : > { %p90_p3 = scmp.ne.s32.totalorder %s525_s10, %s521_s9  ;;  %p91_p4 = scmp.eq.s32.totalorder %s414_s14, 5 }
   0x8   : > { %s590_s18 = scalar_select %p72_p1, %s529_s11, %s74_s16  }
   0x9   : > { %p592_p5 = por %p85_p2, %p84_p0  ;;  %p596_p6 = por %p91_p4, %p90_p3 }
   0xa   : > { %p417_p7 = scmp.ge.s32.totalorder %s533_s12, 1  ;;  %p127_p8 = scmp.lt.s32.totalorder %s533_s12, 7 }
   0xc   : > { %p128_p9 = pnand %p417_p7, %p127_p8 }
   0xd   : > { %s419_s21 = sshll.u32 (!%p128_p9), %s575_s13, 1  ;;  %v172_v0 = vlaneseq (!%p128_p9)  ;;  %s535_s29 = smov (!%p128_p9), 16   ;;  %vm221_vm4 = vcmask (!%p128_p9), 1047680   ;;  %vm314_vm7 = vcmask (!%p128_p9), 130048  }
   0xe   : > { %131 = sbr.rel (%p128_p9) target bundleno = 620 (0x26c), region = 28  ;;  %p155_p10 = scmp.lt.s32.totalorder (!%p128_p9), %s419_s21, 11 }
   0xf   : > { %v604_v1 = vshrl.u32 (!%p128_p9), %v172_v0, 7  ;;  %s536_s30 = smov (!%p128_p9), 113   ;;  %s537_s3 = smov (!%p128_p9), 127   ;;  %v200_v45 = vand.u32 (!%p128_p9), 127, %v172_v0 }
  0x10   : > { %s151_s4 = sand.u32 (!%p128_p9), 1, %s525_s10   ;;  %s424_s8 = sshll.u32 (!%p128_p9), %s575_s13, 7 }
  0x11   : > { %v174_v2 = vadd.s32 (!%p128_p9), 8, %v604_v1  ;;  %v179_v3 = vand.u32 (!%p128_p9), 15, %v604_v1  ;;  %vm209_vm0 = vcmp.lt.s32.totalorder (!%p128_p9), %v604_v1, 1  ;;  %vm216_vm2 = vcmp.lt.s32.totalorder (!%p128_p9), %v604_v1, 7  ;;  %s418_s5 = sshll.u32 (!%p128_p9), %s151_s4, 3  ;;  %s538_s13 = smov (!%p128_p9), [#allocation2]  }
  0x12   : > { %vm205_vm5 = vcmp.eq.s32.totalorder (!%p128_p9), %v200_v45, 0  ;;  %vm206_vm6 = vcmp.eq.s32.totalorder (!%p128_p9), %v200_v45, 15  ;;  %s153_s6 = scalar_lea.vmem (!%p128_p9), [#allocation2], %s418_s5  ;;  %s475_s24 = sshll.u32 (!%p128_p9), %s538_s13, 4  ;;  %s476_s24 = int_to_ptr.vmem [resolvable:$false] %s475_s24 }
  0x13   : > { %v186_v10 = vand.u32 (!%p128_p9), 15, %v174_v2  ;;  %vm616_vm1 = vcmp.eq.s32.totalorder (!%p128_p9), %v179_v3, 0  ;;  %s343_s7 = sshll.u32 (!%p128_p9), %s153_s6, 4  ;;  %s675_s7 = int_to_ptr.vmem [resolvable:$true] %s343_s7 }
  0x14   : > { %s471_s23 = scalar_lea.vmem (!%p128_p9), %s675_s7, 128  ;;  %p478_p0 = scmp.lt.s32.totalorder (!%p128_p9), %s675_s7, %s476_s24 }
  0x15   : > { %s734_s21 = smov (!%p155_p10, %s419_s21), 11  ;;  %vm623_vm3 = vcmp.eq.s32.totalorder %v186_v10, 15  ;;  %p472_p11 = scmp.ne.s32.totalorder %s675_s7, %s471_s23 }
  0x16   : > { %s420_s22 = sshll.u32 %s734_s21, 3  ;;  %s680_s21 = scalar_lea.hbm %s722_s2, %s424_s8 }
  0x17   : > { %s158_s25 = scalar_lea.vmem %s720_s0, %s420_s22  ;;  %s164_s28 = scalar_lea.vmem %s721_s1, %s420_s22 }
  0x18   : > { %v166_v4 = vld [vmem:[%s158_s25] sm:$0xff]  ;;  %v167_v6 = vld [vmem:[%s158_s25 + $0x8] sm:$0xff]  ;;  %s330_s22 = scalar_lea.sflag [#allocation3], %s151_s4  ;;  %p473_p12 = pnand %p472_p11, %p592_p5 }
  0x19   : > { %v168_v5 = vld [vmem:[%s164_s28] sm:$0xff]  ;;  %v169_v8 = vld [vmem:[%s164_s28 + $0x8] sm:$0xff]  ;;  %s477_s25 = scalar_lea.vmem %s476_s24, 256 }
  0x1a   : > { %v170_v7 = vsub.f32 %v166_v4, %v168_v5  ;;  %v171_v9 = vsub.f32 %v167_v6, %v169_v8  ;;  %p474_p13 = pneg %p473_p12  ;;  %p479_p1 = scmp.lt.s32.totalorder %s477_s25, %s471_s23 }
  0x1c   : > { %222 = vrot.lane.b32.xlu0 %v170_v7, %s535_s29  ;;  %v207_v12 = vrot.slane %v170_v7, 7  ;;  %v214_v13 = vrot.slane %v170_v7, 1  ;;  %v208_v14 = vrot.slane %v171_v9, 7  ;;  %v215_v15 = vrot.slane %v171_v9, 1  ;;  %p480_p2 = por %p479_p1, %p478_p0 }
  0x1d   : > { %v252_v16 = vmul.f32 2.0, %v170_v7  ;;  %v253_v17 = vmul.f32 2.0, %v171_v9 }
  0x1e   : > { %v211_v18 = vsel %vm209_vm0, %v208_v14, %v207_v12  ;;  %v210_v20 = vsel %vm209_vm0, %v207_v12, %v208_v14  ;;  %v218_v21 = vsel %vm216_vm2, %v215_v15, %v214_v13  ;;  %v217_v23 = vsel %vm216_vm2, %v214_v13, %v215_v15  ;;  %p481_p3 = pnand %p480_p2, %p474_p13 }
  0x1f   : > { %v212_v22 = vsel %vm616_vm1, 0.0, %v211_v18  ;;  %v255_v25 = vadd.f32 %v253_v17, %v210_v20  ;;  %v220_v26 = vsel %vm623_vm3, 0.0, %v218_v21 }
  0x20   : > { %225 = vrot.lane.b32.xlu0 %v171_v9, %s535_s29  ;;  %v254_v24 = vadd.f32 %v252_v16, %v212_v22 }
  0x21   : > { %v257_v28 = vadd.f32 %v255_v25, %v220_v26 }
  0x22   : > { %v256_v27 = vadd.f32 %v254_v24, %v217_v23 }
  0x24   : > { %262 = vrot.lane.b32.xlu1 %v256_v27, %s535_s29 }
  0x28   : > { %265 = vrot.lane.b32.xlu1 %v257_v28, %s535_s29 }
  0x8e   : > { %v223_v29 = vpop.permute.xlu0 %222 }
  0x8f   : > { %v224_v30 = vsel %vm221_vm4, %v223_v29, %v170_v7 }
  0x90   : > { %228 = vrot.lane.b32.xlu0 %v224_v30, %s535_s29 }
  0x92   : > { %v226_v31 = vpop.permute.xlu0 %225 }
  0x93   : > { %v227_v32 = vsel %vm221_vm4, %v226_v31, %v171_v9 }
  0x94   : > { %230 = vrot.lane.b32.xlu1 %v227_v32, %s535_s29 }
  0x96   : > { %v263_v33 = vpop.permute.xlu1 %262 }
  0x97   : > { %v264_v34 = vsel %vm221_vm4, %v263_v33, %v256_v27 }
  0x98   : > { %268 = vrot.lane.b32.xlu0 %v264_v34, %s535_s29 }
  0x9a   : > { %v266_v35 = vpop.permute.xlu1 %265 }
  0x9b   : > { %v267_v36 = vsel %vm221_vm4, %v266_v35, %v257_v28 }
  0x9c   : > { %270 = vrot.lane.b32.xlu1 %v267_v36, %s535_s29 }
 0x102   : > { %v229_v37 = vpop.permute.xlu0 %228 }
 0x103   : > { %v232_v38 = vsel %vm221_vm4, %v229_v37, %v170_v7 }
 0x104   : > { %236 = vrot.lane.b32.xlu0 %v232_v38, %s536_s30 }
 0x106   : > { %v231_v39 = vpop.permute.xlu1 %230 }
 0x107   : > { %v233_v40 = vsel %vm221_vm4, %v231_v39, %v171_v9 }
 0x108   : > { %244 = vrot.lane.b32.xlu0 %v232_v38, %s537_s3  ;;  %238 = vrot.lane.b32.xlu1 %v233_v40, %s536_s30 }
 0x10a   : > { %v269_v41 = vpop.permute.xlu0 %268 }
 0x10b   : > { %v272_v42 = vsel %vm221_vm4, %v269_v41, %v256_v27 }
 0x10c   : > { %246 = vrot.lane.b32.xlu1 %v233_v40, %s537_s3  ;;  %276 = vrot.lane.b32.xlu0 %v272_v42, %s537_s3 }
 0x10e   : > { %v271_v43 = vpop.permute.xlu1 %270 }
 0x10f   : > { %v273_v44 = vsel %vm221_vm4, %v271_v43, %v257_v28 }
 0x110   : > { %284 = vrot.lane.b32.xlu0 %v272_v42, %s536_s30  ;;  %278 = vrot.lane.b32.xlu1 %v273_v44, %s537_s3 }
 0x114   : > { %286 = vrot.lane.b32.xlu1 %v273_v44, %s536_s30 }
 0x176   : > { %v237_v46 = vpop.permute.xlu0 %236 }
 0x177   : > { %v242_v47 = vsel %vm205_vm5, 0.0, %v237_v46 }
 0x178   : > { %v258_v52 = vadd.f32 %v252_v16, %v242_v47 }
 0x17a   : > { %v245_v48 = vpop.permute.xlu0 %244  ;;  %v239_v49 = vpop.permute.xlu1 %238 }
 0x17b   : > { %v250_v50 = vsel %vm206_vm6, 0.0, %v245_v48  ;;  %v243_v51 = vsel %vm205_vm5, 0.0, %v239_v49 }
 0x17c   : > { %v260_v53 = vadd.f32 %v258_v52, %v250_v50  ;;  %v259_v54 = vadd.f32 %v253_v17, %v243_v51 }
 0x17e   : > { %v247_v55 = vpop.permute.xlu1 %246  ;;  %v277_v56 = vpop.permute.xlu0 %276  ;;  %v292_v59 = vrot.slane %v260_v53, 7  ;;  %v298_v60 = vrot.slane %v260_v53, 1 }
 0x17f   : > { %v251_v57 = vsel %vm206_vm6, 0.0, %v247_v55  ;;  %v282_v63 = vsel %vm206_vm6, 0.0, %v277_v56 }
 0x180   : > { %v261_v58 = vadd.f32 %v259_v54, %v251_v57 }
 0x182   : > { %v293_v61 = vrot.slane %v261_v58, 7  ;;  %v299_v62 = vrot.slane %v261_v58, 1  ;;  %v285_v0 = vpop.permute.xlu0 %284  ;;  %v279_v2 = vpop.permute.xlu1 %278 }
 0x183   : > { %v290_v5 = vsel %vm205_vm5, 0.0, %v285_v0  ;;  %v283_v16 = vsel %vm206_vm6, 0.0, %v279_v2 }
 0x184   : > { %v295_v3 = vsel %vm209_vm0, %v293_v61, %v292_v59  ;;  %v301_v4 = vsel %vm216_vm2, %v299_v62, %v298_v60  ;;  %v300_v6 = vsel %vm216_vm2, %v298_v60, %v299_v62  ;;  %v304_v8 = vsub.f32 %v282_v63, %v290_v5 }
 0x185   : > { %v296_v7 = vsel %vm616_vm1, 0.0, %v295_v3  ;;  %v294_v9 = vsel %vm209_vm0, %v292_v59, %v293_v61  ;;  %v303_v12 = vsel %vm623_vm3, 0.0, %v301_v4 }
 0x186   : > { %v306_v10 = vsub.f32 %v296_v7, %v300_v6  ;;  %v307_v13 = vsub.f32 %v294_v9, %v303_v12  ;;  %v287_v14 = vpop.permute.xlu1 %286  ;;  %v308_v18 = vand.u32 2147483647, %v304_v8 }
 0x187   : > { %v291_v17 = vsel %vm205_vm5, 0.0, %v287_v14 }
 0x188   : > { %v310_v15 = vand.u32 2147483647, %v306_v10  ;;  %v305_v20 = vsub.f32 %v283_v16, %v291_v17  ;;  %v311_v11 = vand.u32 2147483647, %v307_v13 }
 0x18a   : > { %v312_v21 = vadd.f32 %v310_v15, %v308_v18  ;;  %v309_v22 = vand.u32 2147483647, %v305_v20 }
 0x18c   : > { %v313_v1 = vadd.f32 %v311_v11, %v309_v22  ;;  %v315_v23 = vsel %vm314_vm7, %v312_v21, 0.0 }
 0x18e   : > { %v316_v24 = vsel %vm314_vm7, %v313_v1, 0.0 }
 0x18f   : > { %v317_v19 = vadd.f32 %v316_v24, %v315_v23 }
 0x191   : > { %318 = vadd.xlane.f32.xlu0 %v317_v19 }
 0x21e   : > { %v319_v25 = vpop.xlane.xlu0 %318 }
 0x21f   : > { %v320_v26 = vrot.slane %v319_v25, 4 }
 0x221   : > { %v321_v27 = vadd.f32 %v320_v26, %v319_v25 }
 0x223   : > { %v322_v28 = vrot.slane %v321_v27, 2 }
 0x225   : > { %v323_v29 = vadd.f32 %v322_v28, %v321_v27 }
 0x227   : > { %v324_v30 = vrot.slane %v323_v29, 1 }
 0x229   : > { %v325_v31 = vadd.f32 %v324_v30, %v323_v29 }
 0x22b   : > { %427 = vpush %v325_v31 }
 0x25c   : > { %s428_s14 = spop %427 }
 0x25d   : > { %v327_v32 = vstv %s428_s14 }
 0x25e   : > { %328 = vst [vmem:[%s153_s6] sm:$0xff] %v327_v32 }
 0x25f   : > { %484 = shalt.err (!%p481_p3)
}
 0x260   : > { %s485_s26 = scalar_lea.hbm %s680_s21, 128  ;;  %s489_s29 = scalar_lea.hbm %s722_s2, 768 }
 0x261   : > { %p486_p4 = scmp.ne.s32.totalorder %s680_s21, %s485_s26  ;;  %p490_p9 = scmp.lt.u32.totalorder %s680_s21, %s722_s2 }
 0x262   : > { %p491_p10 = scmp.lt.u32.totalorder %s489_s29, %s485_s26  ;;  %p493_p12 = scmp.lt.u32.totalorder %s485_s26, %s680_s21 }
 0x263   : > { %p487_p7 = pnand %p486_p4, %p592_p5 }
 0x264   : > { %p492_p11 = por %p491_p10, %p490_p9 }
 0x265   : > { %p488_p8 = pneg %p487_p7 }
 0x266   : > { %p494_p13 = por %p493_p12, %p492_p11 }
 0x268   : > { %p495_p0 = pnand %p494_p13, %p488_p8 }
 0x26a   : > { %498 = shalt.err (!%p495_p0)
}
 0x26b   : > { %429 = dma.vmem_to_hbm [thread:$0]  (%p592_p5), %s675_s7, 128, %s680_s21, %s330_s22  }
 0x26c PF: > { %p435_p1 = scmp.ge.s32.totalorder %s533_s12, 2  ;;  %s355_s4 = sand.u32 1, %s521_s9  }
 0x26d   : > { %s356_s5 = scalar_lea.sflag [#allocation3], %s355_s4 }
 0x26e   : > { %p432_p2 = pnand %p435_p1, %p596_p6 }
 0x270   : > { %516 = dma.done.wait (!%p432_p2), %s356_s5, 128  }
 0x271   : > { %518 = vsyncadd (!%p432_p2), %s356_s5, 4294967168  ;;  %p12_p3 = scmp.ge.s32.totalorder %s579_s15, 8   ;;  %s729_s9 = smov %s525_s10 }
 0x272   : > { %s730_s10 = smov %s529_s11  ;;  %s731_s11 = smov %s590_s18 }
 0x273   : > { %s732_s12 = smov %s579_s15  ;;  %14 = sbr.rel (!%p12_p3) target bundleno = 3 (0x3), region = 66 }
 0x27a   :  { %361 = vsyncpa [#allocation3], 1 }
 0x27b   :  { %363 = vsyncpa [#allocation3 + $0x1], 1 }

</bundles_post_ra>
